<compile_context>
chip_gen: v7x
topology: tpu7x:2x2x1
jax: 0.10.0
libtpu: 0.0.40
codegen_flags: <defaults>
</compile_context>

<pallas_src>
import functools

import jax
import jax.numpy as jnp
from jax.experimental import pallas as pl
from jax.experimental.pallas import tpu as pltpu

HIDDEN = 100   # PyTorch hidden width
H = 128        # lane-padded hidden width (multiple of the 128-lane vreg width)
OUT = 2        # real output features


def _mlp_kernel(x_ref,
                w0_ref, b0_ref,
                w1_ref, b1_ref,
                w11_ref, b11_ref,
                w2_ref, b2_ref,
                o_ref):
    x = x_ref[...]           # (tm, 2) f32
    w0 = w0_ref[...]         # (2, H)  f32

    # layer 0: (2 -> H). K=2 contraction done as two VPU FMAs instead of an
    # MXU push/drain round-trip (removes the MXU result-FIFO dep at kernel top).
    h = x[:, 0:1] * w0[0:1, :] + x[:, 1:2] * w0[1:2, :] + b0_ref[...]

    # 3x shared linear1 + relu: bf16 operands (MXU-native on v5e/v6e/v7x),
    # f32 accumulation.
    # TODO(synk): on v5e, if the bundle dump shows the MXU push slot binding,
    # drive the shared w1 via pltpu.matmul_push_rhs once + matmul_acc_lhs x3.
    w1 = w1_ref[...]          # (H, H) bf16
    b1 = b1_ref[...]          # (1, H) f32
    for _ in range(3):
        h = jnp.maximum(
            jnp.dot(h.astype(jnp.bfloat16), w1,
                    preferred_element_type=jnp.float32) + b1, 0.0)

    # (the module's extra relu(x) here is a no-op on already non-negative data
    #  and is dropped — saves a full-tile VPU sweep per grid step)

    # linear1_1 + relu
    h = jnp.maximum(
        jnp.dot(h.astype(jnp.bfloat16), w11_ref[...],
                preferred_element_type=jnp.float32) + b11_ref[...], 0.0)

    # linear2 (H -> H padded; only the first 2 output columns are real).  Only
    # those 2 columns are stored: 8 B/row of HBM writeback instead of 512 B/row.
    y = jnp.dot(h.astype(jnp.bfloat16), w2_ref[...],
                preferred_element_type=jnp.float32) + b2_ref[...]
    o_ref[...] = y[:, :OUT].astype(o_ref.dtype)


def _round_up(n, m):
    return (n + m - 1) // m * m


def _pad2(a, rows, cols, dtype=None):
    a = jnp.pad(a, ((0, rows - a.shape[0]), (0, cols - a.shape[1])))
    return a if dtype is None else a.astype(dtype)


def _pad_params(params):
    """Zero-pad the 100-wide hidden dim to 128 and cast the hidden weight
    matrices to bf16 (one-time cost, MXU-native operand dtype).  Padding is
    exact: padded lanes stay zero through relu and every contraction; biases
    stay f32 (added after the f32-accumulated matmul)."""
    w0, b0, w1, b1, w11, b11, w2, b2 = params
    bf16 = jnp.bfloat16
    return (_pad2(w0, 2, H), _pad2(b0, 1, H),
            _pad2(w1, H, H, bf16), _pad2(b1, 1, H),
            _pad2(w11, H, H, bf16), _pad2(b11, 1, H),
            _pad2(w2, H, H, bf16), _pad2(b2, 1, H))


def _choose_tiling(n, tile_m):
    """Pick (tm, n_pad): balance tiles to minimise batch-padding waste and keep
    >= 2 grid steps for non-tiny batches (so the "parallel" grid axis can shard
    across both v7x TensorCores).  tm stays a multiple of 8 (sublane rule)."""
    n8 = _round_up(max(n, 1), 8)
    min_grid = 2 if n8 >= 256 else 1          # irrelevant on v5e/v6e (1 TC)
    grid = max(pl.cdiv(n8, tile_m), min_grid)
    tm = _round_up(pl.cdiv(n8, grid), 8)
    grid = pl.cdiv(n8, tm)
    return tm, grid * tm


@functools.partial(jax.jit, static_argnames=("tile_m",))
def linear_regression_forward(x, params, tile_m=512):
    n, f = x.shape
    assert f == 2
    w0, b0, w1, b1, w11, b11, w2, b2 = _pad_params(params)

    tm, n_pad = _choose_tiling(n, tile_m)
    x_p = jnp.pad(x, ((0, n_pad - n), (0, 0)))

    # Constant index_map => weight/bias blocks stay VMEM-resident; the pipeline
    # elides re-copies when the block index does not change between steps.
    # TODO(synk): pipeline_mode=pl.Buffered(1) on these specs would also drop the
    # unused second buffer (~100 KiB VMEM); skipped for portability.
    const = lambda a: pl.BlockSpec(a.shape, lambda i: (0, 0))

    y_pad = pl.pallas_call(
        _mlp_kernel,
        out_shape=jax.ShapeDtypeStruct((n_pad, OUT), jnp.float32),
        grid=(n_pad // tm,),
        in_specs=[pl.BlockSpec((tm, 2), lambda i: (i, 0)),
                  const(w0), const(b0),
                  const(w1), const(b1),
                  const(w11), const(b11),
                  const(w2), const(b2)],
        # Narrow (tm, 2) output block: last dim equals the full array dim, so the
        # (8,128) rule is satisfied; total writeback is tiny vs the 5 matmuls.
        out_specs=pl.BlockSpec((tm, OUT), lambda i: (i, 0)),
        compiler_params=pltpu.CompilerParams(
            dimension_semantics=("parallel",)),
    )(x_p, w0, b0, w1, b1, w11, b11, w2, b2)

    return y_pad[:n]


def init_params(key):
    """nn.Linear-style init, U(-1/sqrt(fan_in), 1/sqrt(fan_in)).

    Weights stored as (in_features, out_features); biases as (1, out_features).
    Kept at the PyTorch-faithful HIDDEN=100 width; padding/bf16 cast happen in
    the wrapper."""
    def linear(k, fan_in, fan_out):
        kw, kb = jax.random.split(k)
        bound = 1.0 / jnp.sqrt(jnp.float32(fan_in))
        w = jax.random.uniform(kw, (fan_in, fan_out), jnp.float32, -bound, bound)
        b = jax.random.uniform(kb, (1, fan_out), jnp.float32, -bound, bound)
        return w, b

    k0, k1, k11, k2 = jax.random.split(key, 4)
    w0, b0 = linear(k0, 2, HIDDEN)          # self.linear
    w1, b1 = linear(k1, HIDDEN, HIDDEN)     # self.linear1 (reused 3x)
    w11, b11 = linear(k11, HIDDEN, HIDDEN)  # self.linear1_1
    w2, b2 = linear(k2, HIDDEN, 2)          # self.linear2
    return (w0, b0, w1, b1, w11, b11, w2, b2)


def reference_forward_f32(x, params):
    """Exact PyTorch-semantics forward in full f32 (Precision.HIGHEST)."""
    (w0, b0, w1, b1, w11, b11, w2, b2) = params
    dot = lambda a, b: jnp.dot(a, b, precision=jax.lax.Precision.HIGHEST)
    h = dot(x, w0) + b0
    for _ in range(3):
        h = jax.nn.relu(dot(h, w1) + b1)
    h = jax.nn.relu(h)
    h = jax.nn.relu(dot(h, w11) + b11)
    return dot(h, w2) + b2


def reference_forward_bf16(x, params):
    """Same forward with the kernel's bf16-operand / f32-accumulate contract
    (tight-tolerance correctness gate for the Pallas kernel)."""
    (w0, b0, w1, b1, w11, b11, w2, b2) = params
    bdot = lambda a, b: jnp.dot(a.astype(jnp.bfloat16), b.astype(jnp.bfloat16),
                                preferred_element_type=jnp.float32)
    h = jnp.dot(x, w0, precision=jax.lax.Precision.HIGHEST) + b0
    for _ in range(3):
        h = jax.nn.relu(bdot(h, w1) + b1)
    h = jax.nn.relu(h)
    h = jax.nn.relu(bdot(h, w11) + b11)
    return bdot(h, w2) + b2


if __name__ == "__main__":
    key = jax.random.PRNGKey(0)
    k_param, k_x, k_x2 = jax.random.split(key, 3)

    params = init_params(k_param)

    # small batch (single tile)
    x = jax.random.normal(k_x, (8, 2), jnp.float32)
    y = linear_regression_forward(x, params)
    jax.block_until_ready(y)
    assert y.shape == (8, 2)
    assert jnp.allclose(y, reference_forward_bf16(x, params),
                        atol=2e-3, rtol=2e-3), "mismatch vs bf16 reference (N=8)"
    assert jnp.allclose(y, reference_forward_f32(x, params),
                        atol=1e-1, rtol=1e-1), "mismatch vs f32 reference (N=8)"

    # larger batch: exercises grid > 1, balanced batch tiling, parallel axis
    x2 = jax.random.normal(k_x2, (300, 2), jnp.float32)
    y2 = linear_regression_forward(x2, params)
    jax.block_until_ready(y2)
    assert y2.shape == (300, 2)
    assert jnp.allclose(y2, reference_forward_bf16(x2, params),
                        atol=2e-3, rtol=2e-3), "mismatch vs bf16 reference (N=300)"
    assert jnp.allclose(y2, reference_forward_f32(x2, params),
                        atol=1e-1, rtol=1e-1), "mismatch vs f32 reference (N=300)"

    print("KERNEL_OK")
</pallas_src>

<mosaic_0001>
module attributes {stable_mosaic.version = 11 : i64} {
  func.func @_mlp_kernel(%arg0: i32, %arg1: memref<8x2xf32, #tpu.memory_space<vmem>>, %arg2: memref<2x128xf32, #tpu.memory_space<vmem>>, %arg3: memref<1x128xf32, #tpu.memory_space<vmem>>, %arg4: memref<128x128xbf16, #tpu.memory_space<vmem>>, %arg5: memref<1x128xf32, #tpu.memory_space<vmem>>, %arg6: memref<128x128xbf16, #tpu.memory_space<vmem>>, %arg7: memref<1x128xf32, #tpu.memory_space<vmem>>, %arg8: memref<128x128xbf16, #tpu.memory_space<vmem>>, %arg9: memref<1x128xf32, #tpu.memory_space<vmem>>, %arg10: memref<8x2xf32, #tpu.memory_space<vmem>>) attributes {dimension_semantics = [#tpu.dimension_semantics<parallel>], iteration_bounds = array<i64: 1>, scalar_prefetch = 0 : i64, scratch_operands = 0 : i64, tpu.core_type = #tpu.core_type<tc>, window_params = [{transform_indices = @transform_0, window_bounds = array<i64: 8, 2>}, {pipeline_mode = #tpu.pipeline_mode<synchronous>, transform_indices = @transform_1, window_bounds = array<i64: 2, 128>}, {pipeline_mode = #tpu.pipeline_mode<synchronous>, transform_indices = @transform_2, window_bounds = array<i64: 1, 128>}, {pipeline_mode = #tpu.pipeline_mode<synchronous>, transform_indices = @transform_3, window_bounds = array<i64: 128, 128>}, {pipeline_mode = #tpu.pipeline_mode<synchronous>, transform_indices = @transform_4, window_bounds = array<i64: 1, 128>}, {pipeline_mode = #tpu.pipeline_mode<synchronous>, transform_indices = @transform_5, window_bounds = array<i64: 128, 128>}, {pipeline_mode = #tpu.pipeline_mode<synchronous>, transform_indices = @transform_6, window_bounds = array<i64: 1, 128>}, {pipeline_mode = #tpu.pipeline_mode<synchronous>, transform_indices = @transform_7, window_bounds = array<i64: 128, 128>}, {pipeline_mode = #tpu.pipeline_mode<synchronous>, transform_indices = @transform_8, window_bounds = array<i64: 1, 128>}, {transform_indices = @transform_9, window_bounds = array<i64: 8, 2>}]} {
    %c0 = arith.constant 0 : index
    %c0_0 = arith.constant 0 : index
    %0 = vector.load %arg1[%c0, %c0_0] : memref<8x2xf32, #tpu.memory_space<vmem>>, vector<8x2xf32>
    %c0_1 = arith.constant 0 : index
    %c0_2 = arith.constant 0 : index
    %1 = vector.load %arg2[%c0_1, %c0_2] : memref<2x128xf32, #tpu.memory_space<vmem>>, vector<2x128xf32>
    %2 = vector.extract_strided_slice %0 {offsets = [0, 0], sizes = [8, 1], strides = [1, 1]} : vector<8x2xf32> to vector<8x1xf32>
    %3 = vector.extract_strided_slice %1 {offsets = [0, 0], sizes = [1, 128], strides = [1, 1]} : vector<2x128xf32> to vector<1x128xf32>
    %4 = vector.broadcast %2 : vector<8x1xf32> to vector<8x128xf32>
    %5 = vector.broadcast %3 : vector<1x128xf32> to vector<8x128xf32>
    %6 = arith.mulf %4, %5 : vector<8x128xf32>
    %7 = vector.extract_strided_slice %0 {offsets = [0, 1], sizes = [8, 1], strides = [1, 1]} : vector<8x2xf32> to vector<8x1xf32>
    %8 = vector.extract_strided_slice %1 {offsets = [1, 0], sizes = [1, 128], strides = [1, 1]} : vector<2x128xf32> to vector<1x128xf32>
    %9 = vector.broadcast %7 : vector<8x1xf32> to vector<8x128xf32>
    %10 = vector.broadcast %8 : vector<1x128xf32> to vector<8x128xf32>
    %11 = arith.mulf %9, %10 : vector<8x128xf32>
    %12 = arith.addf %6, %11 : vector<8x128xf32>
    %c0_3 = arith.constant 0 : index
    %c0_4 = arith.constant 0 : index
    %13 = vector.load %arg3[%c0_3, %c0_4] : memref<1x128xf32, #tpu.memory_space<vmem>>, vector<1x128xf32>
    %14 = vector.broadcast %13 : vector<1x128xf32> to vector<8x128xf32>
    %15 = arith.addf %12, %14 : vector<8x128xf32>
    %c0_5 = arith.constant 0 : index
    %c0_6 = arith.constant 0 : index
    %16 = vector.load %arg4[%c0_5, %c0_6] : memref<128x128xbf16, #tpu.memory_space<vmem>>, vector<128x128xbf16>
    %c0_7 = arith.constant 0 : index
    %c0_8 = arith.constant 0 : index
    %17 = vector.load %arg5[%c0_7, %c0_8] : memref<1x128xf32, #tpu.memory_space<vmem>>, vector<1x128xf32>
    %18 = arith.truncf %15 : vector<8x128xf32> to vector<8x128xbf16>
    %cst = arith.constant dense<0.000000e+00> : vector<8x128xf32>
    %19 = tpu.matmul %18, %16, %cst {dimension_numbers = #tpu.dot_dimension_numbers<[1], [0], [0], [1], [0, 0, 1, 1], [], []>} : vector<8x128xbf16>, vector<128x128xbf16>, vector<8x128xf32> -> vector<8x128xf32>
    %20 = vector.broadcast %17 : vector<1x128xf32> to vector<8x128xf32>
    %21 = arith.addf %19, %20 : vector<8x128xf32>
    %cst_9 = arith.constant 0.000000e+00 : f32
    %22 = vector.broadcast %cst_9 : f32 to vector<8x128xf32>
    %23 = arith.maximumf %21, %22 : vector<8x128xf32>
    %24 = arith.truncf %23 : vector<8x128xf32> to vector<8x128xbf16>
    %cst_10 = arith.constant dense<0.000000e+00> : vector<8x128xf32>
    %25 = tpu.matmul %24, %16, %cst_10 {dimension_numbers = #tpu.dot_dimension_numbers<[1], [0], [0], [1], [0, 0, 1, 1], [], []>} : vector<8x128xbf16>, vector<128x128xbf16>, vector<8x128xf32> -> vector<8x128xf32>
    %26 = vector.broadcast %17 : vector<1x128xf32> to vector<8x128xf32>
    %27 = arith.addf %25, %26 : vector<8x128xf32>
    %cst_11 = arith.constant 0.000000e+00 : f32
    %28 = vector.broadcast %cst_11 : f32 to vector<8x128xf32>
    %29 = arith.maximumf %27, %28 : vector<8x128xf32>
    %30 = arith.truncf %29 : vector<8x128xf32> to vector<8x128xbf16>
    %cst_12 = arith.constant dense<0.000000e+00> : vector<8x128xf32>
    %31 = tpu.matmul %30, %16, %cst_12 {dimension_numbers = #tpu.dot_dimension_numbers<[1], [0], [0], [1], [0, 0, 1, 1], [], []>} : vector<8x128xbf16>, vector<128x128xbf16>, vector<8x128xf32> -> vector<8x128xf32>
    %32 = vector.broadcast %17 : vector<1x128xf32> to vector<8x128xf32>
    %33 = arith.addf %31, %32 : vector<8x128xf32>
    %cst_13 = arith.constant 0.000000e+00 : f32
    %34 = vector.broadcast %cst_13 : f32 to vector<8x128xf32>
    %35 = arith.maximumf %33, %34 : vector<8x128xf32>
    %36 = arith.truncf %35 : vector<8x128xf32> to vector<8x128xbf16>
    %c0_14 = arith.constant 0 : index
    %c0_15 = arith.constant 0 : index
    %37 = vector.load %arg6[%c0_14, %c0_15] : memref<128x128xbf16, #tpu.memory_space<vmem>>, vector<128x128xbf16>
    %cst_16 = arith.constant dense<0.000000e+00> : vector<8x128xf32>
    %38 = tpu.matmul %36, %37, %cst_16 {dimension_numbers = #tpu.dot_dimension_numbers<[1], [0], [0], [1], [0, 0, 1, 1], [], []>} : vector<8x128xbf16>, vector<128x128xbf16>, vector<8x128xf32> -> vector<8x128xf32>
    %c0_17 = arith.constant 0 : index
    %c0_18 = arith.constant 0 : index
    %39 = vector.load %arg7[%c0_17, %c0_18] : memref<1x128xf32, #tpu.memory_space<vmem>>, vector<1x128xf32>
    %40 = vector.broadcast %39 : vector<1x128xf32> to vector<8x128xf32>
    %41 = arith.addf %38, %40 : vector<8x128xf32>
    %cst_19 = arith.constant 0.000000e+00 : f32
    %42 = vector.broadcast %cst_19 : f32 to vector<8x128xf32>
    %43 = arith.maximumf %41, %42 : vector<8x128xf32>
    %44 = arith.truncf %43 : vector<8x128xf32> to vector<8x128xbf16>
    %c0_20 = arith.constant 0 : index
    %c0_21 = arith.constant 0 : index
    %45 = vector.load %arg8[%c0_20, %c0_21] : memref<128x128xbf16, #tpu.memory_space<vmem>>, vector<128x128xbf16>
    %cst_22 = arith.constant dense<0.000000e+00> : vector<8x128xf32>
    %46 = tpu.matmul %44, %45, %cst_22 {dimension_numbers = #tpu.dot_dimension_numbers<[1], [0], [0], [1], [0, 0, 1, 1], [], []>} : vector<8x128xbf16>, vector<128x128xbf16>, vector<8x128xf32> -> vector<8x128xf32>
    %c0_23 = arith.constant 0 : index
    %c0_24 = arith.constant 0 : index
    %47 = vector.load %arg9[%c0_23, %c0_24] : memref<1x128xf32, #tpu.memory_space<vmem>>, vector<1x128xf32>
    %48 = vector.broadcast %47 : vector<1x128xf32> to vector<8x128xf32>
    %49 = arith.addf %46, %48 : vector<8x128xf32>
    %50 = vector.extract_strided_slice %49 {offsets = [0, 0], sizes = [8, 2], strides = [1, 1]} : vector<8x128xf32> to vector<8x2xf32>
    %c0_25 = arith.constant 0 : index
    %c0_26 = arith.constant 0 : index
    %51 = vector.load %arg10[%c0_25, %c0_26] : memref<8x2xf32, #tpu.memory_space<vmem>>, vector<8x2xf32>
    tpu.vector_store %arg10[%c0_25, %c0_26], %50 {strides = array<i32>} : memref<8x2xf32, #tpu.memory_space<vmem>>, vector<8x2xf32>,
    return
  }
  func.func @transform_0(%arg0: i32) -> (i32, i32) {
    %c0_i32 = arith.constant 0 : i32
    %c0_i32_0 = arith.constant 0 : i32
    return %arg0, %c0_i32 : i32, i32
  }
  func.func @transform_1(%arg0: i32) -> (i32, i32) {
    %c0_i32 = arith.constant 0 : i32
    %c0_i32_0 = arith.constant 0 : i32
    %c0_i32_1 = arith.constant 0 : i32
    return %c0_i32, %c0_i32_0 : i32, i32
  }
  func.func @transform_2(%arg0: i32) -> (i32, i32) {
    %c0_i32 = arith.constant 0 : i32
    %c0_i32_0 = arith.constant 0 : i32
    %c0_i32_1 = arith.constant 0 : i32
    return %c0_i32, %c0_i32_0 : i32, i32
  }
  func.func @transform_3(%arg0: i32) -> (i32, i32) {
    %c0_i32 = arith.constant 0 : i32
    %c0_i32_0 = arith.constant 0 : i32
    %c0_i32_1 = arith.constant 0 : i32
    return %c0_i32, %c0_i32_0 : i32, i32
  }
  func.func @transform_4(%arg0: i32) -> (i32, i32) {
    %c0_i32 = arith.constant 0 : i32
    %c0_i32_0 = arith.constant 0 : i32
    %c0_i32_1 = arith.constant 0 : i32
    return %c0_i32, %c0_i32_0 : i32, i32
  }
  func.func @transform_5(%arg0: i32) -> (i32, i32) {
    %c0_i32 = arith.constant 0 : i32
    %c0_i32_0 = arith.constant 0 : i32
    %c0_i32_1 = arith.constant 0 : i32
    return %c0_i32, %c0_i32_0 : i32, i32
  }
  func.func @transform_6(%arg0: i32) -> (i32, i32) {
    %c0_i32 = arith.constant 0 : i32
    %c0_i32_0 = arith.constant 0 : i32
    %c0_i32_1 = arith.constant 0 : i32
    return %c0_i32, %c0_i32_0 : i32, i32
  }
  func.func @transform_7(%arg0: i32) -> (i32, i32) {
    %c0_i32 = arith.constant 0 : i32
    %c0_i32_0 = arith.constant 0 : i32
    %c0_i32_1 = arith.constant 0 : i32
    return %c0_i32, %c0_i32_0 : i32, i32
  }
  func.func @transform_8(%arg0: i32) -> (i32, i32) {
    %c0_i32 = arith.constant 0 : i32
    %c0_i32_0 = arith.constant 0 : i32
    %c0_i32_1 = arith.constant 0 : i32
    return %c0_i32, %c0_i32_0 : i32, i32
  }
  func.func @transform_9(%arg0: i32) -> (i32, i32) {
    %c0_i32 = arith.constant 0 : i32
    %c0_i32_0 = arith.constant 0 : i32
    return %arg0, %c0_i32 : i32, i32
  }
}

</mosaic_0001>

<bundles_post_ra>
// kernel: linear_regression_forward.1
= control target key start
LH: loop header
LB: loop body
LE: loop exit
PB: predicated region body
PF: predicated region fallthrough
CT: control target
= control target key end

     0   :  { %v694_v0 = vmov 0   ;;  %v695_v2 = vmov 0.0   ;;  %v696_v5 = vmov 1   ;;  %vm697_vm0 = vmmov 0   ;;  %s906_s0 = inlined_call_operand.vmem [shape: f32[8,2], index: 0, kind: input, shape index: {}]   ;;  %s907_s3 = inlined_call_operand.vmem [shape: bf16[128,128], index: 3, kind: input, shape index: {}]   ;;  %s908_s1 = inlined_call_operand.vmem [shape: f32[2,128], index: 1, kind: input, shape index: {}]   ;;  %s909_s2 = inlined_call_operand.vmem [shape: f32[1,128], index: 2, kind: input, shape index: {}]   ;;  %s910_s4 = inlined_call_operand.vmem [shape: f32[1,128], index: 4, kind: input, shape index: {}]   ;;  %s911_s5 = inlined_call_operand.vmem [shape: bf16[128,128], index: 5, kind: input, shape index: {}]   ;;  %s912_s7 = inlined_call_operand.vmem [shape: bf16[128,128], index: 7, kind: input, shape index: {}]   ;;  %s913_s6 = inlined_call_operand.vmem [shape: f32[1,128], index: 6, kind: input, shape index: {}]   ;;  %s914_s8 = inlined_call_operand.vmem [shape: f32[1,128], index: 8, kind: input, shape index: {}]   ;;  %s915_s9 = inlined_call_operand.vmem [shape: f32[8,2], index: 9, kind: output, shape index: {}]  }
   0x1   :  { %668 = vset.pattern.permute.xlu0 %v694_v0  ;;  %v33_v1 = vld [vmem:[%s906_s0] sm:$0xff]  ;;  %564 = vmatprep.subr.bf16.mxu0 %v695_v2  ;;  %v762_v4 = vld [vmem:[%s907_s3 + $0x8] sm:$0xff]   ;;  %v672_v6 = vld [vmem:[%s907_s3 + $0x10] sm:$0xff]   ;;  %v40_v12 = vlaneseq  ;;  %vm485_vm1 = vcmask 15360  }
   0x2   :  { %37 = vperm.xlu0 %668, %v33_v1   ;;  %v755_v3 = vld [vmem:[%s907_s3] sm:$0xff]   ;;  %584 = vmatprep.subr.bf16.mxu1 %v695_v2  ;;  %v673_v7 = vld [vmem:[%s907_s3 + $0x18] sm:$0xff]   ;;  %v675_v9 = vld [vmem:[%s907_s3 + $0x28] sm:$0xff]  }
   0x3   :  { %565 = vmatpush3.bf16.msra.mxu0 %v755_v3  ;;  %585 = vmatpush3.bf16.msra.mxu1 %v755_v3  ;;  %v674_v8 = vld [vmem:[%s907_s3 + $0x20] sm:$0xff]   ;;  %v676_v10 = vld [vmem:[%s907_s3 + $0x30] sm:$0xff]   ;;  %v677_v11 = vld [vmem:[%s907_s3 + $0x38] sm:$0xff]   ;;  %v41_v13 = vshrl.u32 %v40_v12, 7 }
   0x4   :  { %566 = vmatprep.subr.bf16.mxu0 %v695_v2  ;;  %586 = vmatprep.subr.bf16.mxu1 %v695_v2  ;;  %v34_v16 = vld [vmem:[%s908_s1] sm:$0x3]  ;;  %v679_v36 = vld [vmem:[%s911_s5 + $0x8] sm:$0xff]   ;;  %v680_v37 = vld [vmem:[%s911_s5 + $0x10] sm:$0xff]  }
   0x5   :  { %580 = vmatprep.mubr.msk.bf16.mxu0 %vm697_vm0, %v695_v2  ;;  %600 = vmatprep.mubr.msk.bf16.mxu1 %vm697_vm0, %v695_v2  ;;  %v42_v14 = vsub.s32 0, %v41_v13  ;;  %v51_v15 = vsub.s32 1, %v41_v13  ;;  %v491_v23 = vld [vmem:[%s909_s2] ss:$0 sm:$0xff]  ;;  %v681_v38 = vld [vmem:[%s911_s5 + $0x18] sm:$0xff]   ;;  %v683_v40 = vld [vmem:[%s911_s5 + $0x28] sm:$0xff]  }
   0x6   :  { %669 = vset.pattern.permute.xlu0 %v696_v5  ;;  %v826_v27 = vld [vmem:[%s910_s4] ss:$0 sm:$0xff]  ;;  %v684_v48 = vld [vmem:[%s911_s5 + $0x30] sm:$0xff]   ;;  %v685_v49 = vld [vmem:[%s911_s5 + $0x38] sm:$0xff]  }
   0x7   :  { %46 = vperm.xlu0 %669, %v33_v1   ;;  %567 = vmatpush3.bf16.msra.mxu0 %v762_v4  ;;  %v43_v18 = vrot.slane %v34_v16, %v42_v14  ;;  %v52_v19 = vrot.slane %v34_v16, %v51_v15  ;;  %v678_v35 = vld [vmem:[%s911_s5] sm:$0xff]   ;;  %v687_v51 = vld [vmem:[%s912_s7 + $0x8] sm:$0xff]   ;;  %v688_v52 = vld [vmem:[%s912_s7 + $0x10] sm:$0xff]  }
   0x8   :  { %587 = vmatpush3.bf16.msra.mxu1 %v762_v4  ;;  %568 = vmatprep.subr.bf16.mxu0 %v695_v2  ;;  %v682_v39 = vld [vmem:[%s911_s5 + $0x20] sm:$0xff]   ;;  %v689_v53 = vld [vmem:[%s912_s7 + $0x18] sm:$0xff]   ;;  %v691_v55 = vld [vmem:[%s912_s7 + $0x28] sm:$0xff]  }
   0x9   :  { %588 = vmatprep.subr.bf16.mxu1 %v695_v2  ;;  %v686_v50 = vld [vmem:[%s912_s7] sm:$0xff]   ;;  %v692_v63 = vld [vmem:[%s912_s7 + $0x30] sm:$0xff]   ;;  %v693_v0 = vld [vmem:[%s912_s7 + $0x38] sm:$0xff]  }
   0xa   :  { %v690_v54 = vld [vmem:[%s912_s7 + $0x20] sm:$0xff]  }
   0xb   :  { %569 = vmatpush3.bf16.msra.mxu0 %v672_v6  ;;  %v501_v1 = vld [vmem:[%s913_s6] ss:$0 sm:$0xff] }
   0xc   :  { %589 = vmatpush3.bf16.msra.mxu1 %v672_v6  ;;  %570 = vmatprep.subr.bf16.mxu0 %v695_v2 }
   0xd   :  { %590 = vmatprep.subr.bf16.mxu1 %v695_v2 }
   0xf   :  { %571 = vmatpush3.bf16.msra.mxu0 %v673_v7 }
  0x10   :  { %591 = vmatpush3.bf16.msra.mxu1 %v673_v7  ;;  %572 = vmatprep.subr.bf16.mxu0 %v695_v2 }
  0x11   :  { %592 = vmatprep.subr.bf16.mxu1 %v695_v2 }
  0x13   :  { %573 = vmatpush3.bf16.msra.mxu0 %v674_v8 }
  0x14   :  { %593 = vmatpush3.bf16.msra.mxu1 %v674_v8  ;;  %574 = vmatprep.subr.bf16.mxu0 %v695_v2 }
  0x15   :  { %594 = vmatprep.subr.bf16.mxu1 %v695_v2 }
  0x17   :  { %575 = vmatpush3.bf16.msra.mxu0 %v675_v9 }
  0x18   :  { %595 = vmatpush3.bf16.msra.mxu1 %v675_v9  ;;  %576 = vmatprep.subr.bf16.mxu0 %v695_v2 }
  0x19   :  { %596 = vmatprep.subr.bf16.mxu1 %v695_v2 }
  0x1b   :  { %577 = vmatpush3.bf16.msra.mxu0 %v676_v10 }
  0x1c   :  { %597 = vmatpush3.bf16.msra.mxu1 %v676_v10  ;;  %578 = vmatprep.subr.bf16.mxu0 %v695_v2 }
  0x1d   :  { %598 = vmatprep.subr.bf16.mxu1 %v695_v2 }
  0x1f   :  { %579 = vmatpush3.bf16.msra.mxu0 %v677_v11 }
  0x20   :  { %599 = vmatpush3.bf16.msra.mxu1 %v677_v11  ;;  %604 = vmatprep.subr.bf16.mxu0 %v695_v2 }
  0x21   :  { %624 = vmatprep.subr.bf16.mxu1 %v695_v2 }
  0x81   :  { %v38_v17 = vpop.permute.xlu0 %37 }
  0x82   :  { %v44_v21 = vmul.f32 %v43_v18, %v38_v17 }
  0x86   :  { %v47_v20 = vpop.permute.xlu0 %46 }
  0x87   :  { %v53_v22 = vmul.f32 %v52_v19, %v47_v20 }
  0x89   :  { %v54_v24 = vadd.f32 %v53_v22, %v44_v21 }
  0x8b   :  { %v62_v25 = vadd.f32 %v491_v23, %v54_v24 }
  0x8d   :  { %v80_v26 = vpack.c.bf16 %v62_v25, %v62_v25 }
  0x8f   :  { %581 = vmatmul.mubr.bf16.vlgmr.msra.gmra.mrb[0].mxu0 %v80_v26 }
  0x90   :  { %605 = vmatpush3.bf16.msra.mxu0 %v755_v3  ;;  %620 = vmatprep.mubr.msk.bf16.mxu0 %vm697_vm0, %v695_v2 }
  0x91   :  { %606 = vmatprep.subr.bf16.mxu0 %v695_v2 }
  0x94   :  { %607 = vmatpush3.bf16.msra.mxu0 %v762_v4 }
  0x95   :  { %608 = vmatprep.subr.bf16.mxu0 %v695_v2 }
  0x98   :  { %609 = vmatpush3.bf16.msra.mxu0 %v672_v6 }
  0x99   :  { %610 = vmatprep.subr.bf16.mxu0 %v695_v2 }
  0x9c   :  { %611 = vmatpush3.bf16.msra.mxu0 %v673_v7 }
  0x9d   :  { %612 = vmatprep.subr.bf16.mxu0 %v695_v2 }
  0xa0   :  { %613 = vmatpush3.bf16.msra.mxu0 %v674_v8 }
  0xa1   :  { %614 = vmatprep.subr.bf16.mxu0 %v695_v2 }
  0xa4   :  { %615 = vmatpush3.bf16.msra.mxu0 %v675_v9 }
  0xa5   :  { %616 = vmatprep.subr.bf16.mxu0 %v695_v2 }
  0xa8   :  { %617 = vmatpush3.bf16.msra.mxu0 %v676_v10 }
  0xa9   :  { %618 = vmatprep.subr.bf16.mxu0 %v695_v2 }
  0xac   :  { %619 = vmatpush3.bf16.msra.mxu0 %v677_v11 }
  0xad   :  { %644 = vmatprep.subr.bf16.mxu0 %v695_v2 }
 0x162   :  { %v169_v28 = vpop.f32.mrb[0].mxu0 }
 0x163   :  { %v170_v29 = vadd.f32 %v826_v27, %v169_v28  ;;  %v582_v30 = vpop.f32.mrb[1].mxu0 }
 0x164   :  { %v172_v31 = vpop.f32.mrb[2].mxu0 }
 0x165   :  { %v175_v32 = vmax.f32 %v170_v29, 0.0  ;;  %v583_v33 = vpop.f32.mrb[3].mxu0 }
 0x167   :  { %v176_v34 = vpack.c.bf16 %v175_v32, %v175_v32 }
 0x169   :  { %601 = vmatmul.mubr.bf16.vlgmr.msra.gmra.mrb[0].mxu1 %v176_v34 }
 0x16a   :  { %640 = vmatprep.mubr.msk.bf16.mxu1 %vm697_vm0, %v695_v2  ;;  %625 = vmatpush3.bf16.msra.mxu1 %v678_v35 }
 0x16b   :  { %626 = vmatprep.subr.bf16.mxu1 %v695_v2 }
 0x16e   :  { %627 = vmatpush3.bf16.msra.mxu1 %v679_v36 }
 0x16f   :  { %628 = vmatprep.subr.bf16.mxu1 %v695_v2 }
 0x172   :  { %629 = vmatpush3.bf16.msra.mxu1 %v680_v37 }
 0x173   :  { %630 = vmatprep.subr.bf16.mxu1 %v695_v2 }
 0x176   :  { %631 = vmatpush3.bf16.msra.mxu1 %v681_v38 }
 0x177   :  { %632 = vmatprep.subr.bf16.mxu1 %v695_v2 }
 0x17a   :  { %633 = vmatpush3.bf16.msra.mxu1 %v682_v39 }
 0x17b   :  { %634 = vmatprep.subr.bf16.mxu1 %v695_v2 }
 0x17e   :  { %635 = vmatpush3.bf16.msra.mxu1 %v683_v40 }
 0x17f   :  { %636 = vmatprep.subr.bf16.mxu1 %v695_v2 }
 0x182   :  { %637 = vmatpush3.bf16.msra.mxu1 %v684_v48 }
 0x183   :  { %638 = vmatprep.subr.bf16.mxu1 %v695_v2 }
 0x186   :  { %639 = vmatpush3.bf16.msra.mxu1 %v685_v49 }
 0x23c   :  { %v211_v41 = vpop.f32.mrb[0].mxu1 }
 0x23d   :  { %v212_v42 = vadd.f32 %v826_v27, %v211_v41  ;;  %v602_v43 = vpop.f32.mrb[1].mxu1 }
 0x23e   :  { %v214_v44 = vpop.f32.mrb[2].mxu1 }
 0x23f   :  { %v217_v45 = vmax.f32 %v212_v42, 0.0  ;;  %v603_v46 = vpop.f32.mrb[3].mxu1 }
 0x241   :  { %v218_v47 = vpack.c.bf16 %v217_v45, %v217_v45 }
 0x243   :  { %621 = vmatmul.mubr.bf16.vlgmr.msra.gmra.mrb[4].mxu0 %v218_v47 }
 0x244   :  { %660 = vmatprep.mubr.msk.bf16.mxu0 %vm697_vm0, %v695_v2  ;;  %645 = vmatpush3.bf16.msra.mxu0 %v686_v50 }
 0x245   :  { %646 = vmatprep.subr.bf16.mxu0 %v695_v2 }
 0x248   :  { %647 = vmatpush3.bf16.msra.mxu0 %v687_v51 }
 0x249   :  { %648 = vmatprep.subr.bf16.mxu0 %v695_v2 }
 0x24c   :  { %649 = vmatpush3.bf16.msra.mxu0 %v688_v52 }
 0x24d   :  { %650 = vmatprep.subr.bf16.mxu0 %v695_v2 }
 0x250   :  { %651 = vmatpush3.bf16.msra.mxu0 %v689_v53 }
 0x251   :  { %652 = vmatprep.subr.bf16.mxu0 %v695_v2 }
 0x254   :  { %653 = vmatpush3.bf16.msra.mxu0 %v690_v54 }
 0x255   :  { %654 = vmatprep.subr.bf16.mxu0 %v695_v2 }
 0x258   :  { %655 = vmatpush3.bf16.msra.mxu0 %v691_v55 }
 0x259   :  { %656 = vmatprep.subr.bf16.mxu0 %v695_v2 }
 0x25c   :  { %657 = vmatpush3.bf16.msra.mxu0 %v692_v63 }
 0x25d   :  { %658 = vmatprep.subr.bf16.mxu0 %v695_v2  ;;  %v510_v2 = vld [vmem:[%s914_s8] ss:$0 sm:$0xff] }
 0x260   :  { %659 = vmatpush3.bf16.msra.mxu0 %v693_v0 }
 0x316   :  { %v253_v56 = vpop.f32.mrb[4].mxu0 }
 0x317   :  { %v254_v57 = vadd.f32 %v826_v27, %v253_v56  ;;  %v622_v58 = vpop.f32.mrb[5].mxu0 }
 0x318   :  { %v256_v59 = vpop.f32.mrb[6].mxu0 }
 0x319   :  { %v259_v60 = vmax.f32 %v254_v57, 0.0  ;;  %v623_v61 = vpop.f32.mrb[7].mxu0 }
 0x31b   :  { %v260_v62 = vpack.c.bf16 %v259_v60, %v259_v60 }
 0x31d   :  { %641 = vmatmul.mubr.bf16.vlgmr.msra.gmra.mrb[4].mxu1 %v260_v62 }
 0x3f0   :  { %v366_v3 = vpop.f32.mrb[4].mxu1 }
 0x3f1   :  { %v367_v4 = vadd.f32 %v501_v1, %v366_v3  ;;  %v642_v5 = vpop.f32.mrb[5].mxu1 }
 0x3f2   :  { %v369_v6 = vpop.f32.mrb[6].mxu1 }
 0x3f3   :  { %v372_v7 = vmax.f32 %v367_v4, 0.0  ;;  %v643_v8 = vpop.f32.mrb[7].mxu1 }
 0x3f5   :  { %v373_v9 = vpack.c.bf16 %v372_v7, %v372_v7 }
 0x3f7   :  { %661 = vmatmul.mubr.bf16.vlgmr.msra.gmra.mrb[8].mxu0 %v373_v9 }
 0x4ca   :  { %v479_v10 = vpop.f32.mrb[8].mxu0 }
 0x4cb   :  { %v480_v11 = vadd.f32 %v510_v2, %v479_v10  ;;  %v662_v12 = vpop.f32.mrb[9].mxu0 }
 0x4cc   :  { %v482_v13 = vpop.f32.mrb[10].mxu0 }
 0x4cd   :  { %486 = vst.msk [vmem:[%s915_s9] sm:$0xff] %vm485_vm1, %v480_v11  ;;  %v663_v14 = vpop.f32.mrb[11].mxu0 }

</bundles_post_ra>
